<compile_context>
chip_gen: v6e
topology: v6e:2x2x1
jax: 0.10.0
libtpu: 0.0.40
codegen_flags: <defaults>
</compile_context>

<pallas_src>
import functools
import math

import jax
import jax.numpy as jnp
from jax import lax
from jax.experimental import pallas as pl
from jax.experimental.pallas import tpu as pltpu


def _graphconv_kernel(*refs, inter, intra, k_weights):
    """One (graph, row-stripe) grid step.

    refs = (xn, gn, [xp, hp], [b], packed_params, out), assembled according to
    the static `inter` / `intra` flags.  packed_params stacks the weights this
    configuration uses (k_weights rows, order matching the lane concat below)
    followed by one bias row.
    """
    it = iter(refs)
    xn_ref = next(it)                 # (N, in_ft)
    gn_ref = next(it)                 # (tm, N)   row stripe of GN
    if inter:
        xp_ref = next(it)             # (P, in_ft)
        hp_ref = next(it)             # (P, tm)   column stripe of HP (== rows of HP.T)
    if intra:
        b_ref = next(it)              # (tm, out_ft)
    w_ref = next(it)                  # (k_weights + 1, out_ft): [Wn; (Wp); (WB); bias]
    out_ref = next(it)                # (tm, out_ft)

    cdt = xn_ref.dtype                # compute dtype (bf16 or f32)

    # GN @ XN  -> (tm, in_ft), f32 MXU accumulation.
    parts = [jnp.dot(gn_ref[...], xn_ref[...],
                     preferred_element_type=jnp.float32).astype(cdt)]
    if inter:
        # HP.T @ XP without an in-kernel transpose: contract dim 0 with dim 0.
        parts.append(
            lax.dot_general(hp_ref[...], xp_ref[...],
                            dimension_numbers=(((0,), (0,)), ((), ())),
                            preferred_element_type=jnp.float32).astype(cdt))
    if intra:
        parts.append(b_ref[...])

    lhs = parts[0] if len(parts) == 1 else jnp.concatenate(parts, axis=-1)

    w = w_ref[:k_weights, :]          # static slices: zero runtime cost
    bias = w_ref[k_weights:, :]       # (1, out_ft)

    # Single fused output matmul: [GN@XN | HP.T@XP | B] @ [Wn; Wp; WB].
    x = jnp.dot(lhs, w, preferred_element_type=jnp.float32)
    x = x + bias.astype(jnp.float32)
    out_ref[...] = jnp.maximum(x, 0.0).astype(out_ref.dtype)


def graph_conv_batched(xn, gn, hn, xp, gp, hp, b, params, *,
                       inter=False, intra=True, _intra=True,
                       compute_dtype=jnp.bfloat16, block_rows=None):
    """Batched GraphConv forward.

    Shapes (G = number of independent graphs sharing the layer weights):
      xn:(G,N,in_ft)  gn:(G,N,N)  hn:(G,N,N, unused)  xp:(G,P,in_ft)
      gp:(G,P,P, unused)  hp:(G,P,N)  b:(G,N,out_ft)
      params = (Wn(in_ft,out_ft), Wp(in_ft,out_ft), WB(out_ft,out_ft), bias(out_ft,))
    Returns (G, N, out_ft) in xn.dtype.
    """
    del hn, gp  # accepted for API parity with the module; unused by forward()
    wn, wp, wb, bias = params
    g_b, n, in_ft = xn.shape
    p = xp.shape[1]
    out_ft = wn.shape[1]
    inter = bool(inter)
    intra_eff = bool(intra and _intra)
    out_dtype = xn.dtype

    # Pack only the weights this configuration uses (order matches the lane
    # concatenation in the kernel), plus the bias as a final row -> one DMA.
    pieces = [wn]
    if inter:
        pieces.append(wp)
    if intra_eff:
        pieces.append(wb)
    k_weights = sum(int(pc.shape[0]) for pc in pieces)
    packed = jnp.concatenate(pieces + [bias.reshape(1, out_ft)],
                             axis=0).astype(compute_dtype)

    # Row tiling of GN / B / output: whole graph if small, 256-row stripes
    # otherwise (keeps GN's VMEM footprint bounded, e.g. for v7x's 64 MiB VMEM).
    tm = block_rows if block_rows is not None else (n if n <= 256 else 256)
    # TODO(synk): support N % tm != 0 (ragged last row stripe) via masking.
    assert n % tm == 0, "row tile must divide N"
    grid = (g_b, n // tm)

    inputs = [xn.astype(compute_dtype), gn.astype(compute_dtype)]
    in_specs = [
        pl.BlockSpec((None, n, in_ft), lambda g, r: (g, 0, 0)),
        pl.BlockSpec((None, tm, n), lambda g, r: (g, r, 0)),
    ]
    if inter:
        inputs += [xp.astype(compute_dtype), hp.astype(compute_dtype)]
        in_specs += [
            pl.BlockSpec((None, p, in_ft), lambda g, r: (g, 0, 0)),
            pl.BlockSpec((None, p, tm), lambda g, r: (g, 0, r)),
        ]
    if intra_eff:
        inputs += [b.astype(compute_dtype)]
        in_specs += [pl.BlockSpec((None, tm, out_ft), lambda g, r: (g, r, 0))]
    inputs += [packed]
    in_specs += [pl.BlockSpec(packed.shape, lambda g, r: (0, 0))]

    kernel = functools.partial(_graphconv_kernel, inter=inter,
                               intra=intra_eff, k_weights=k_weights)

    # Explicit scoped-VMEM budget (v5e defaults to 16 MiB): estimate the
    # double-buffered per-step footprint and give it headroom, capped well
    # under v7x's 64 MiB physical VMEM.  At demo sizes this is a no-op.
    itemsize = jnp.dtype(compute_dtype).itemsize
    est = 2 * itemsize * (n * in_ft + tm * n + p * in_ft + p * tm
                          + 2 * tm * out_ft + packed.size)
    vmem_limit = int(min(max(2 * est, 16 * 2**20), 48 * 2**20))

    return pl.pallas_call(
        kernel,
        out_shape=jax.ShapeDtypeStruct((g_b, n, out_ft), out_dtype),
        grid=grid,
        in_specs=in_specs,
        out_specs=pl.BlockSpec((None, tm, out_ft), lambda g, r: (g, r, 0)),
        compiler_params=pltpu.CompilerParams(
            dimension_semantics=("parallel", "parallel"),
            vmem_limit_bytes=vmem_limit),
    )(*inputs)


def graph_conv(xn, gn, hn, xp, gp, hp, b, params, *,
               inter=False, intra=True, _intra=True,
               compute_dtype=jnp.bfloat16):
    """Single-graph GraphConv forward (adds a batch axis of 1)."""
    out = graph_conv_batched(xn[None], gn[None], hn[None], xp[None], gp[None],
                             hp[None], b[None], params, inter=inter,
                             intra=intra, _intra=_intra,
                             compute_dtype=compute_dtype)
    return out[0]


def _reference(xn, gn, xp, hp, b, wn, wp, wb, bias, *, inter, intra):
    x = gn @ (xn @ wn)
    if inter:
        x = x + hp.T @ (xp @ wp)
    if intra:
        x = x + b @ wb
    x = x + bias
    return jnp.maximum(x, 0.0)


if __name__ == "__main__":
    G, N, P, in_ft, out_ft = 4, 16, 8, 32, 32

    key = jax.random.PRNGKey(0)
    keys = jax.random.split(key, 11)

    # Deterministic parameter init mirroring reset_parameters():
    # uniform(-stdv, stdv) with stdv = 1/sqrt(out_ft).
    stdv = 1.0 / math.sqrt(out_ft)
    wn = jax.random.uniform(keys[0], (in_ft, out_ft), jnp.float32, -stdv, stdv)
    wp = jax.random.uniform(keys[1], (in_ft, out_ft), jnp.float32, -stdv, stdv)
    wb = jax.random.uniform(keys[2], (out_ft, out_ft), jnp.float32, -stdv, stdv)
    bias = jax.random.uniform(keys[3], (out_ft,), jnp.float32, -stdv, stdv)
    params = (wn, wp, wb, bias)

    # A batch of G independent graphs sharing the layer parameters.
    xn = jax.random.normal(keys[4], (G, N, in_ft), jnp.float32)
    gn = jax.random.normal(keys[5], (G, N, N), jnp.float32)
    hn = jax.random.normal(keys[6], (G, N, N), jnp.float32)   # unused by fwd
    xp = jax.random.normal(keys[7], (G, P, in_ft), jnp.float32)
    gp = jax.random.normal(keys[8], (G, P, P), jnp.float32)   # unused by fwd
    hp = jax.random.normal(keys[9], (G, P, N), jnp.float32)
    b = jax.random.normal(keys[10], (G, N, out_ft), jnp.float32)

    def ref_batched(inter, intra):
        def one(xn1, gn1, xp1, hp1, b1):
            return _reference(xn1, gn1, xp1, hp1, b1, wn, wp, wb, bias,
                              inter=inter, intra=intra)
        return jax.vmap(one)(xn, gn, xp, hp, b)

    # 1) Full path (inter=True, intra=True), f32 compute: tight check.
    out_full_f32 = jax.block_until_ready(
        graph_conv_batched(xn, gn, hn, xp, gp, hp, b, params,
                           inter=True, intra=True, _intra=True,
                           compute_dtype=jnp.float32))
    ref_full = ref_batched(True, True)
    assert out_full_f32.shape == (G, N, out_ft)
    assert jnp.allclose(out_full_f32, ref_full, atol=1e-3, rtol=1e-3)

    # 2) Module-default path (inter=False, intra=True), f32 compute.
    out_def_f32 = jax.block_until_ready(
        graph_conv_batched(xn, gn, hn, xp, gp, hp, b, params,
                           inter=False, intra=True, _intra=True,
                           compute_dtype=jnp.float32))
    ref_def = ref_batched(False, True)
    assert jnp.allclose(out_def_f32, ref_def, atol=1e-3, rtol=1e-3)

    # 3) _intra=False at call time disables the B @ WB branch.
    out_noB = jax.block_until_ready(
        graph_conv_batched(xn, gn, hn, xp, gp, hp, b, params,
                           inter=False, intra=True, _intra=False,
                           compute_dtype=jnp.float32))
    ref_noB = ref_batched(False, False)
    assert jnp.allclose(out_noB, ref_noB, atol=1e-3, rtol=1e-3)

    # 4) bf16 compute (default) on the full path: loose tolerances.
    out_full_bf16 = jax.block_until_ready(
        graph_conv_batched(xn, gn, hn, xp, gp, hp, b, params,
                           inter=True, intra=True, _intra=True,
                           compute_dtype=jnp.bfloat16))
    assert jnp.allclose(out_full_bf16, ref_full, atol=3e-1, rtol=5e-2)

    # 5) Single-graph convenience wrapper matches graph 0 of the reference.
    out_single = jax.block_until_ready(
        graph_conv(xn[0], gn[0], hn[0], xp[0], gp[0], hp[0], b[0], params,
                   inter=True, intra=True, _intra=True,
                   compute_dtype=jnp.float32))
    assert out_single.shape == (N, out_ft)
    assert jnp.allclose(out_single, ref_full[0], atol=1e-3, rtol=1e-3)

    print("KERNEL_OK")
</pallas_src>

<mosaic_0001>
module attributes {stable_mosaic.version = 11 : i64} {
  func.func @_graphconv_kernel(%arg0: i32, %arg1: i32, %arg2: memref<1x16x32xf32, #tpu.memory_space<vmem>>, %arg3: memref<1x16x16xf32, #tpu.memory_space<vmem>>, %arg4: memref<1x8x32xf32, #tpu.memory_space<vmem>>, %arg5: memref<1x8x16xf32, #tpu.memory_space<vmem>>, %arg6: memref<1x16x32xf32, #tpu.memory_space<vmem>>, %arg7: memref<97x32xf32, #tpu.memory_space<vmem>>, %arg8: memref<1x16x32xf32, #tpu.memory_space<vmem>>) attributes {dimension_semantics = [#tpu.dimension_semantics<parallel>, #tpu.dimension_semantics<parallel>], iteration_bounds = array<i64: 4, 1>, scalar_prefetch = 0 : i64, scratch_operands = 0 : i64, tpu.core_type = #tpu.core_type<tc>, window_params = [{transform_indices = @transform_0, window_bounds = array<i64: 1, 16, 32>}, {transform_indices = @transform_1, window_bounds = array<i64: 1, 16, 16>}, {transform_indices = @transform_2, window_bounds = array<i64: 1, 8, 32>}, {transform_indices = @transform_3, window_bounds = array<i64: 1, 8, 16>}, {transform_indices = @transform_4, window_bounds = array<i64: 1, 16, 32>}, {pipeline_mode = #tpu.pipeline_mode<synchronous>, transform_indices = @transform_5, window_bounds = array<i64: 97, 32>}, {transform_indices = @transform_6, window_bounds = array<i64: 1, 16, 32>}]} {
    %c0 = arith.constant 0 : index
    %c0_0 = arith.constant 0 : index
    %c0_1 = arith.constant 0 : index
    %0 = vector.load %arg3[%c0, %c0_0, %c0_1] : memref<1x16x16xf32, #tpu.memory_space<vmem>>, vector<1x16x16xf32>
    %1 = vector.shape_cast %0 : vector<1x16x16xf32> to vector<16x16xf32>
    %c0_2 = arith.constant 0 : index
    %c0_3 = arith.constant 0 : index
    %c0_4 = arith.constant 0 : index
    %2 = vector.load %arg2[%c0_2, %c0_3, %c0_4] : memref<1x16x32xf32, #tpu.memory_space<vmem>>, vector<1x16x32xf32>
    %3 = vector.shape_cast %2 : vector<1x16x32xf32> to vector<16x32xf32>
    %cst = arith.constant dense<0.000000e+00> : vector<16x32xf32>
    %4 = tpu.matmul %1, %3, %cst {dimension_numbers = #tpu.dot_dimension_numbers<[1], [0], [0], [1], [0, 0, 1, 1], [], []>} : vector<16x16xf32>, vector<16x32xf32>, vector<16x32xf32> -> vector<16x32xf32>
    %c0_5 = arith.constant 0 : index
    %c0_6 = arith.constant 0 : index
    %c0_7 = arith.constant 0 : index
    %5 = vector.load %arg5[%c0_5, %c0_6, %c0_7] : memref<1x8x16xf32, #tpu.memory_space<vmem>>, vector<1x8x16xf32>
    %6 = vector.shape_cast %5 : vector<1x8x16xf32> to vector<8x16xf32>
    %c0_8 = arith.constant 0 : index
    %c0_9 = arith.constant 0 : index
    %c0_10 = arith.constant 0 : index
    %7 = vector.load %arg4[%c0_8, %c0_9, %c0_10] : memref<1x8x32xf32, #tpu.memory_space<vmem>>, vector<1x8x32xf32>
    %8 = vector.shape_cast %7 : vector<1x8x32xf32> to vector<8x32xf32>
    %cst_11 = arith.constant dense<0.000000e+00> : vector<16x32xf32>
    %9 = tpu.matmul %6, %8, %cst_11 {dimension_numbers = #tpu.dot_dimension_numbers<[0], [0], [1], [1], [0, 1, 1, 1], [], []>} : vector<8x16xf32>, vector<8x32xf32>, vector<16x32xf32> -> vector<16x32xf32>
    %c0_12 = arith.constant 0 : index
    %c0_13 = arith.constant 0 : index
    %c0_14 = arith.constant 0 : index
    %10 = vector.load %arg6[%c0_12, %c0_13, %c0_14] : memref<1x16x32xf32, #tpu.memory_space<vmem>>, vector<1x16x32xf32>
    %11 = vector.shape_cast %10 : vector<1x16x32xf32> to vector<16x32xf32>
    %12 = tpu.concatenate %4, %9, %11 in 1 : vector<16x32xf32>, vector<16x32xf32>, vector<16x32xf32> -> vector<16x96xf32>
    %c0_15 = arith.constant 0 : index
    %c0_16 = arith.constant 0 : index
    %13 = vector.load %arg7[%c0_15, %c0_16] : memref<97x32xf32, #tpu.memory_space<vmem>>, vector<96x32xf32>
    %c96 = arith.constant 96 : index
    %c0_17 = arith.constant 0 : index
    %14 = vector.load %arg7[%c96, %c0_17] : memref<97x32xf32, #tpu.memory_space<vmem>>, vector<1x32xf32>
    %cst_18 = arith.constant dense<0.000000e+00> : vector<16x32xf32>
    %15 = tpu.matmul %12, %13, %cst_18 {dimension_numbers = #tpu.dot_dimension_numbers<[1], [0], [0], [1], [0, 0, 1, 1], [], []>} : vector<16x96xf32>, vector<96x32xf32>, vector<16x32xf32> -> vector<16x32xf32>
    %16 = vector.broadcast %14 : vector<1x32xf32> to vector<16x32xf32>
    %17 = arith.addf %15, %16 : vector<16x32xf32>
    %cst_19 = arith.constant 0.000000e+00 : f32
    %18 = vector.broadcast %cst_19 : f32 to vector<16x32xf32>
    %19 = arith.maximumf %17, %18 : vector<16x32xf32>
    %c0_20 = arith.constant 0 : index
    %c0_21 = arith.constant 0 : index
    %c0_22 = arith.constant 0 : index
    %20 = vector.load %arg8[%c0_20, %c0_21, %c0_22] : memref<1x16x32xf32, #tpu.memory_space<vmem>>, vector<1x16x32xf32>
    %21 = vector.shape_cast %20 : vector<1x16x32xf32> to vector<16x32xf32>
    %22 = vector.shape_cast %19 : vector<16x32xf32> to vector<1x16x32xf32>
    tpu.vector_store %arg8[%c0_20, %c0_21, %c0_22], %22 {strides = array<i32>} : memref<1x16x32xf32, #tpu.memory_space<vmem>>, vector<1x16x32xf32>,
    return
  }
  func.func @transform_0(%arg0: i32, %arg1: i32) -> (i32, i32, i32) {
    %c0_i32 = arith.constant 0 : i32
    %c0_i32_0 = arith.constant 0 : i32
    %c0_i32_1 = arith.constant 0 : i32
    return %arg0, %c0_i32, %c0_i32_0 : i32, i32, i32
  }
  func.func @transform_1(%arg0: i32, %arg1: i32) -> (i32, i32, i32) {
    %c0_i32 = arith.constant 0 : i32
    %c0_i32_0 = arith.constant 0 : i32
    return %arg0, %arg1, %c0_i32 : i32, i32, i32
  }
  func.func @transform_2(%arg0: i32, %arg1: i32) -> (i32, i32, i32) {
    %c0_i32 = arith.constant 0 : i32
    %c0_i32_0 = arith.constant 0 : i32
    %c0_i32_1 = arith.constant 0 : i32
    return %arg0, %c0_i32, %c0_i32_0 : i32, i32, i32
  }
  func.func @transform_3(%arg0: i32, %arg1: i32) -> (i32, i32, i32) {
    %c0_i32 = arith.constant 0 : i32
    %c0_i32_0 = arith.constant 0 : i32
    return %arg0, %c0_i32, %arg1 : i32, i32, i32
  }
  func.func @transform_4(%arg0: i32, %arg1: i32) -> (i32, i32, i32) {
    %c0_i32 = arith.constant 0 : i32
    %c0_i32_0 = arith.constant 0 : i32
    return %arg0, %arg1, %c0_i32 : i32, i32, i32
  }
  func.func @transform_5(%arg0: i32, %arg1: i32) -> (i32, i32) {
    %c0_i32 = arith.constant 0 : i32
    %c0_i32_0 = arith.constant 0 : i32
    %c0_i32_1 = arith.constant 0 : i32
    return %c0_i32, %c0_i32_0 : i32, i32
  }
  func.func @transform_6(%arg0: i32, %arg1: i32) -> (i32, i32, i32) {
    %c0_i32 = arith.constant 0 : i32
    %c0_i32_0 = arith.constant 0 : i32
    return %arg0, %arg1, %c0_i32 : i32, i32, i32
  }
}

</mosaic_0001>

<bundles_post_ra>
// kernel: tpu_custom_call.1
= control target key start
LH: loop header
LB: loop body
LE: loop exit
PB: predicated region body
PF: predicated region fallthrough
CT: control target
= control target key end

     0   :  { %s1572_s0 = inlined_call_operand.vmem [shape: f32[4,16,32], index: 0, kind: input, shape index: {}]   ;;  %s1573_s1 = inlined_call_operand.vmem [shape: f32[4,16,16], index: 1, kind: input, shape index: {}]   ;;  %s1574_s2 = inlined_call_operand.hbm [shape: f32[4,8,32], index: 2, kind: input, shape index: {}]   ;;  %s1575_s3 = inlined_call_operand.hbm [shape: f32[4,8,16], index: 3, kind: input, shape index: {}]   ;;  %s1576_s4 = inlined_call_operand.hbm [shape: f32[4,16,32], index: 4, kind: input, shape index: {}]   ;;  %s1577_s5 = inlined_call_operand.vmem [shape: f32[97,32], index: 5, kind: input, shape index: {}]   ;;  %s1578_s6 = inlined_call_operand.hbm [shape: f32[4,16,32], index: 6, kind: output, shape index: {}]  }
   0x1   :  { %1585 = sst [smem:[#allocation18_spill]] %s1575_s3 }
   0x2   :  { %11 = vsyncpa [#allocation3], 0 }
   0x3   :  { %13 = vsyncpa [#allocation3 + $0x1], 0 }
   0x4   :  { %14 = vsyncpa [#allocation6], 0 }
   0x5   :  { %16 = vsyncpa [#allocation6 + $0x1], 0 }
   0x6   :  { %17 = vsyncpa [#allocation4], 0 }
   0x7   :  { %19 = vsyncpa [#allocation4 + $0x1], 0  ;;  %s1316_s21 = smov 0   ;;  %s1318_s22 = smov 0  }
   0x8   :  { %s1320_s23 = smov 0   ;;  %s1322_s24 = smov 0  }
   0x9   :  { %s1324_s25 = smov 0   ;;  %s1326_s26 = smov 0  }
   0xa LB: > { %1586 = sst [smem:[#allocation12_spill]] %s1249_s21  ;;  %s1347_s27 = sadd.s32 4294967295, %s1269_s26   ;;  %s1269_s26 = sphi %s1326_s26, %s25_s26   ;;  %s1265_s25 = sphi %s1324_s25, %s1608_s25   ;;  %s1261_s24 = sphi %s1322_s24, %s1607_s24   ;;  %s1257_s23 = sphi %s1320_s23, %s1603_s23   ;;  %s1253_s22 = sphi %s1318_s22, %s1606_s22   ;;  %s1249_s21 = sphi %s1316_s21, %s1605_s21  }
   0xb   : > { %1587 = sst [smem:[#allocation13_spill]] %s1257_s23  ;;  %s927_s28 = sadd.s32 4294967294, %s1269_s26  }
   0xc   : > { %1588 = sst [smem:[#allocation14_spill]] %s1269_s26  ;;  %s37_s29 = sadd.s32 1, %s1265_s25 }
   0xd   : > { %s98_s30 = sadd.s32 1, %s1257_s23  ;;  %p39_p0 = scmp.ge.s32.totalorder %s37_s29, 4 }
   0xe   : > { %p105_p1 = scmp.ne.s32.totalorder %s1257_s23, %s1253_s22  ;;  %p106_p2 = scmp.eq.s32.totalorder %s1269_s26, 0 }
   0xf   : > { %p111_p3 = scmp.ne.s32.totalorder %s1253_s22, %s1249_s21  ;;  %s1610_s29 = smov (%p39_p0, %s37_s29), 0 }
  0x10   : > { %1589 = sst [smem:[#allocation15_spill]] %s1610_s29  ;;  %p1359_p4 = por %p106_p2, %p105_p1 }
  0x11   : > { %p112_p5 = scmp.eq.s32.totalorder %s1347_s27, 0  ;;  %s95_s8 = ssub.s32 %s1265_s25, %s1610_s29 }
  0x12   : > { %p214_p6 = scmp.eq.s32.totalorder %s1347_s27, 3  ;;  %p96_p7 = scmp.eq.s32.totalorder %s95_s8, 0 }
  0x13   : > { %p1367_p8 = por %p112_p5, %p111_p3  ;;  %p220_p10 = scmp.eq.s32.totalorder %s927_s28, 3 }
  0x14   : > { %p1371_p9 = por %p214_p6, %p105_p1  ;;  %p1044_p12 = scmp.lt.s32.totalorder %s1269_s26, 4 }
  0x15   : > { %s1376_s11 = scalar_select %p96_p7, %s1257_s23, %s98_s30  }
  0x16   : > { %p1378_p11 = por %p220_p10, %p111_p3  ;;  %s1384_s13 = sand.u32 1, %s1257_s23  }
  0x17   : > { %1593 = sst [smem:[#allocation16_spill]] %s1376_s11  ;;  %s930_s14 = sshll.u32 %s1384_s13, 3 }
  0x18   : > { %s1594_s12 = scalar_select %p1378_p11, 1, 0 }
  0x19   : > { %s931_s15 = sshll.u32 %s1265_s25, 7  ;;  %p1390_p13 = pnand %p1044_p12, %p1359_p4 }
  0x1a   : > { %1595 = sst [smem:[#allocation17_spill]] %s1594_s12  ;;  %s282_s17 = sand.u32 1, %s1269_s26  }
  0x1b   : > { %s1597_s3 = sld [smem:[#allocation18_spill]]  ;;  %s286_s28 = scalar_lea.vmem [#allocation5], %s930_s14 }
  0x1c   : > { %s294_s30 = sshll.u32 %s286_s28, 4  ;;  %s934_s8 = sshll.u32 %s1384_s13, 4  ;;  %s295_s30 = int_to_ptr.vmem [resolvable:$true] %s294_s30 }
  0x1d   : > { %s1403_s29 = scalar_lea.sflag [#allocation6], %s282_s17  ;;  %p1103_p0 = pneg %p1390_p13 }
  0x1e   : > { %s1114_s7 = scalar_lea.vmem %s295_s30, 128  ;;  %s1271_s11 = smov [#allocation5]  }
  0x1f   : > { %p1115_p1 = scmp.ne.s32.totalorder %s295_s30, %s1114_s7  ;;  %s1119_s23 = sshll.u32 %s1271_s11, 4  ;;  %s1120_s23 = int_to_ptr.vmem [resolvable:$false] %s1119_s23 }
  0x20   : > { %s1121_s18 = scalar_lea.vmem %s1120_s23, 256  ;;  %p1122_p4 = scmp.lt.s32.totalorder %s295_s30, %s1120_s23 }
  0x21   : > { %s292_s20 = scalar_lea.hbm %s1597_s3, %s931_s15  ;;  %p1117_p2 = pnand %p1115_p1, %p1103_p0 }
  0x22   : > { %p1123_p5 = scmp.lt.s32.totalorder %s1121_s18, %s1114_s7 }
  0x23   : > { %p1118_p3 = pneg %p1117_p2 }
  0x24   : > { %p1124_p6 = por %p1123_p5, %p1122_p4 }
  0x26   : > { %p1125_p7 = pnand %p1124_p6, %p1118_p3 }
  0x28   : > { %1128 = shalt.err (!%p1125_p7)
}
  0x29   : > { %1036 = dma.hbm_to_vmem [thread:$0]  (!%p1390_p13), %s292_s20, 128, %s295_s30, %s1403_s29  }
  0x2a   : > { %s305_s17 = scalar_lea.vmem [#allocation7], %s934_s8  ;;  %p937_p10 = scmp.ge.s32.totalorder %s1269_s26, 1 }
  0x2b   : > { %s314_s11 = sshll.u32 %s305_s17, 4  ;;  %p322_p12 = scmp.lt.s32.totalorder %s1269_s26, 5  ;;  %s1414_s11 = int_to_ptr.vmem [resolvable:$true] %s314_s11 }
  0x2c   : > { %s273_s7 = scalar_lea.hbm %s1574_s2, %s931_s15  ;;  %s268_s18 = scalar_lea.vmem [#allocation2], %s930_s14 }
  0x2d   : > { %p1417_p1 = pnand %p937_p10, %p322_p12  ;;  %s275_s3 = sshll.u32 %s268_s18, 4  ;;  %s276_s3 = int_to_ptr.vmem [resolvable:$true] %s275_s3 }
  0x2e   : > { %s958_s20 = sshll.u32 %s1265_s25, 8  ;;  %s265_s12 = scalar_lea.sflag [#allocation3], %s1384_s13 }
  0x2f   : > { %s1432_s17 = scalar_lea.hbm %s1576_s4, %s958_s20  ;;  %s1142_s21 = scalar_lea.vmem %s276_s3, 128 }
  0x30   : > { %p1143_p2 = scmp.ne.s32.totalorder %s276_s3, %s1142_s21  ;;  %s1272_s26 = smov [#allocation2]  }
  0x31   : > { %s1147_s19 = sshll.u32 %s1272_s26, 4  ;;  %s1148_s19 = int_to_ptr.vmem [resolvable:$false] %s1147_s19 }
  0x32   : > { %p1145_p3 = pnand %p1143_p2, %p1103_p0  ;;  %s1149_s15 = scalar_lea.vmem %s1148_s19, 256 }
  0x33   : > { %p1150_p5 = scmp.lt.s32.totalorder %s276_s3, %s1148_s19  ;;  %p1151_p6 = scmp.lt.s32.totalorder %s1149_s15, %s1142_s21 }
  0x34   : > { %p1146_p4 = pneg %p1145_p3 }
  0x35   : > { %p1152_p7 = por %p1151_p6, %p1150_p5 }
  0x37   : > { %p1153_p10 = pnand %p1152_p7, %p1146_p4 }
  0x39   : > { %1156 = shalt.err (!%p1153_p10)
}
  0x3a   : > { %1033 = dma.hbm_to_vmem [thread:$0]  (!%p1390_p13), %s273_s7, 128, %s276_s3, %s265_s12  }
  0x3b   : > { %s1170_s13 = scalar_lea.vmem %s1414_s11, 256  ;;  %s1273_s26 = smov [#allocation7]  }
  0x3c   : > { %p1171_p12 = scmp.ne.s32.totalorder %s1414_s11, %s1170_s13  ;;  %s1175_s14 = sshll.u32 %s1273_s26, 4  ;;  %s1176_s14 = int_to_ptr.vmem [resolvable:$false] %s1175_s14 }
  0x3d   : > { %s1177_s21 = scalar_lea.vmem %s1176_s14, 512  ;;  %p1178_p5 = scmp.lt.s32.totalorder %s1414_s11, %s1176_s14 }
  0x3e   : > { %p1173_p2 = pnand %p1171_p12, %p1103_p0  ;;  %p1179_p4 = scmp.lt.s32.totalorder %s1177_s21, %s1170_s13 }
  0x40   : > { %p1174_p3 = pneg %p1173_p2  ;;  %p1180_p6 = por %p1179_p4, %p1178_p5 }
  0x42   : > { %p1181_p7 = pnand %p1180_p6, %p1174_p3 }
  0x44   : > { %1184 = shalt.err (!%p1181_p7)
}
  0x45   : > { %s1274_s28 = smov 128   ;;  %s1275_s3 = smov 8  }
  0x46   : > { %1039 = dma.hbm_to_vmem [thread:$0]  (!%p1390_p13), %s1432_s17, 256, %s1414_s11, %s1403_s29, %s1274_s28, %s1274_s28, %s1275_s3  }
  0x47   : > { %326 = sbr.rel (%p1417_p1) target bundleno = 740 (0x2e4), region = 44  ;;  %s1454_s12 = sand.u32 (!%p1417_p1), 1, %s1253_s22  }
  0x48   : > { %s938_s7 = sshll.u32 (!%p1417_p1), %s1454_s12, 3  ;;  %s329_s18 = scalar_lea.sflag (!%p1417_p1), [#allocation3], %s1454_s12 }
  0x49   : > { %s332_s20 = scalar_lea.vmem (!%p1417_p1), [#allocation2], %s938_s7 }
  0x4c   : > { %1236 = dma.done.wait (%p1367_p8), %s329_s18, 128  }
  0x4d   : > { %1238 = vsyncadd (%p1367_p8), %s329_s18, 4294967168  ;;  %s337_s29 = sand.u32 1, %s1347_s27   ;;  %s341_s11 = scalar_lea.vmem [#allocation5], %s938_s7 }
  0x4e   : > { %s338_s16 = scalar_lea.sflag [#allocation6], %s337_s29 }
  0x4f   : > { %1240 = dma.done.wait (%p1367_p8), %s338_s16, 384  }
  0x50   : > { %1242 = vsyncadd (%p1367_p8), %s338_s16, 4294966912  ;;  %p403_p13 = scmp.lt.s32.totalorder %s1261_s24, 3  ;;  %vm424_vm0 = vcmask 130048   ;;  %v506_v0 = vld [vmem:[%s341_s11] sm:$0xff]  ;;  %v507_v5 = vld [vmem:[%s332_s20] sm:$0xff]  ;;  %vm540_vm1 = vcmask 64512  }
  0x51   : > { %508 = vxpose.xlu0.b32.start.end [1/1] (short) (narrow) %v506_v0, 16  ;;  %v657_v8 = vld [vmem:[%s1577_s5 + $0x58] sm:$0xff]  ;;  %v656_v9 = vld [vmem:[%s1577_s5 + $0x50] sm:$0xff]  ;;  %v655_v10 = vld [vmem:[%s1577_s5 + $0x48] sm:$0xff]  ;;  %s940_s28 = sshll.u32 %s1454_s12, 4  ;;  %s1276_s3 = smov 32  }
  0x52   : > { %s404_s23 = scalar_select %p403_p13, %s1261_s24, 3  ;;  %995 = vmatprep.subr.mxu1 %v657_v8  ;;  %v654_v11 = vld [vmem:[%s1577_s5 + $0x40] sm:$0xff]  ;;  %v653_v12 = vld [vmem:[%s1577_s5 + $0x38] sm:$0xff]  ;;  %v652_v13 = vld [vmem:[%s1577_s5 + $0x30] sm:$0xff]  ;;  %vm640_vm2 = vcmask 261120   ;;  %vm643_vm3 = vcmask 523264  }
  0x53   : > { %996 = vmatpush3.msra.mxu1 %v657_v8  ;;  %v651_v14 = vld [vmem:[%s1577_s5 + $0x28] sm:$0xff]  ;;  %v650_v15 = vld [vmem:[%s1577_s5 + $0x20] sm:$0xff]  ;;  %v649_v16 = vld [vmem:[%s1577_s5 + $0x18] sm:$0xff]  ;;  %s350_s7 = scalar_lea.vmem [#allocation7], %s940_s28  ;;  %s1277_s18 = smov 64   ;;  %vm663_vm4 = vcmask 785408  }
  0x54   : > { %s959_s30 = sshll.u32 %s404_s23, 4  ;;  %997 = vmatprep.subr.mxu1 %v656_v9  ;;  %v648_v17 = vld [vmem:[%s1577_s5 + $0x10] sm:$0xff]  ;;  %v647_v18 = vld [vmem:[%s1577_s5 + $0x8] sm:$0xff]  ;;  %v646_v19 = vld [vmem:[%s1577_s5] sm:$0xff]  ;;  %s402_s16 = scalar_lea.vmem [#allocation8], %s940_s28 }
  0x55   : > { %s407_s19 = scalar_lea.vmem %s1572_s0, %s959_s30  ;;  %s416_s27 = scalar_lea.vmem %s1573_s1, %s959_s30  ;;  %998 = vmatpush3.msra.mxu1 %v656_v9  ;;  %v622_v24 = vld [vmem:[%s350_s7] sm:$0xff]  ;;  %v623_v25 = vld [vmem:[%s350_s7 + $0x8] sm:$0xff] }
  0x56   : > { %v423_v1 = vld [vmem:[%s407_s19 + $0x8] sm:$0xff]  ;;  %v422_v2 = vld [vmem:[%s407_s19] sm:$0xff]  ;;  %999 = vmatprep.subr.mxu1 %v655_v10  ;;  %s765_s11 = sshll.u32 %s402_s16, 4  ;;  %s961_s23 = sshll.u32 %s1261_s24, 8  ;;  %s1518_s11 = int_to_ptr.vmem [resolvable:$true] %s765_s11 }
  0x57   : > { %983 = vmatprep.subr.mxu0 %v423_v1  ;;  %v420_v3 = vld [vmem:[%s416_s27] sm:$0xff]  ;;  %v421_v4 = vld [vmem:[%s416_s27 + $0x8] sm:$0xff]  ;;  %1000 = vmatpush3.msra.mxu1 %v655_v10  ;;  %s1523_s17 = scalar_lea.hbm %s1578_s6, %s961_s23  ;;  %s750_s19 = scalar_lea.sflag [#allocation4], %s1454_s12 }
  0x58   : > { %984 = vmatpush3.msra.mxu0 %v423_v1  ;;  %987 = vmatprep.mubr.msk.f32.mxu0 %vm424_vm0, %v420_v3  ;;  %v950_v34 = vld [vmem:[%s1577_s5 + $0x60] ss:$0 sm:$0xff]  ;;  %s1185_s24 = scalar_lea.vmem %s1518_s11, 256  ;;  %s1278_s15 = smov [#allocation8]  }
  0x59   : > { %985 = vmatprep.subr.mxu0 %v422_v2  ;;  %1001 = vmatprep.subr.mxu1 %v654_v11  ;;  %p1186_p8 = scmp.ne.s32.totalorder %s1518_s11, %s1185_s24  ;;  %s1189_s13 = sshll.u32 %s1278_s15, 4  ;;  %s1190_s13 = int_to_ptr.vmem [resolvable:$false] %s1189_s13 }
  0x5a   : > { %986 = vmatpush3.msra.mxu0 %v422_v2  ;;  %1002 = vmatpush3.msra.mxu1 %v654_v11  ;;  %s1191_s27 = scalar_lea.vmem %s1190_s13, 512  ;;  %p1192_p10 = scmp.lt.s32.totalorder %s1518_s11, %s1190_s13 }
  0x5b   : > { %988 = vmatmul.mubr.msk.f32.vlgmr.msra.gmra.mxu0 %vm424_vm0, %v421_v4  ;;  %990 = vmatprep.subr.mxu0 %v507_v5  ;;  %p1187_p0 = pnand %p1186_p8, %p1371_p9  ;;  %p1193_p12 = scmp.lt.s32.totalorder %s1191_s27, %s1185_s24 }
  0x5c   : > { %991 = vmatpush3.msra.mxu0 %v507_v5  ;;  %1003 = vmatprep.subr.mxu1 %v653_v12 }
  0x5d   : > { %1004 = vmatpush3.msra.mxu1 %v653_v12  ;;  %p1188_p1 = pneg %p1187_p0  ;;  %p1194_p2 = por %p1193_p12, %p1192_p10 }
  0x5e   : > { %1005 = vmatprep.subr.mxu1 %v652_v13 }
  0x5f   : > { %1006 = vmatpush3.msra.mxu1 %v652_v13  ;;  %p1195_p3 = pnand %p1194_p2, %p1188_p1 }
  0x60   : > { %1007 = vmatprep.subr.mxu1 %v651_v14 }
  0x61   : > { %1008 = vmatpush3.msra.mxu1 %v651_v14 }
  0x62   : > { %1009 = vmatprep.subr.mxu1 %v650_v15 }
  0x63   : > { %1010 = vmatpush3.msra.mxu1 %v650_v15 }
  0x64   : > { %1011 = vmatprep.subr.mxu1 %v649_v16 }
  0x65   : > { %1012 = vmatpush3.msra.mxu1 %v649_v16 }
  0x66   : > { %1013 = vmatprep.subr.mxu1 %v648_v17 }
  0x67   : > { %1014 = vmatpush3.msra.mxu1 %v648_v17 }
  0x68   : > { %1015 = vmatprep.subr.mxu1 %v647_v18 }
  0x69   : > { %1016 = vmatpush3.msra.mxu1 %v647_v18 }
  0x6a   : > { %1017 = vmatprep.subr.mxu1 %v646_v19 }
  0x6b   : > { %1018 = vmatpush3.msra.mxu1 %v646_v19 }
  0xcd   : > { %v524_v6 = vpop.trf.xlu0 }
  0xce   : > { %992 = vmatprep.mubr.msk.f32.mxu0 %vm540_vm1, %v524_v6 }
  0xd1   : > { %v525_v7 = vpop.trf.xlu0 }
  0xd2   : > { %993 = vmatmul.mubr.msk.f32.vlgmr.msra.gmra.mxu0 %vm540_vm1, %v525_v7 }
 0x11b   : > { %v989_v20 = vpop.f32.mrf.mxu0 }
 0x11d   : > { %v497_v21 = vpop.f32.mrf.mxu0 }
 0x192   : > { %v994_v22 = vpop.f32.mrf.mxu0 }
 0x193   : > { %628 = vrot.lane.b32.xlu1 %v994_v22, %s1276_s3 }
 0x194   : > { %v613_v23 = vpop.f32.mrf.mxu0 }
 0x195   : > { %626 = vrot.lane.b32.xlu0 %v613_v23, %s1276_s3 }
 0x197   : > { %634 = vrot.lane.b32.xlu1 %v622_v24, %s1277_s18 }
 0x19b   : > { %636 = vrot.lane.b32.xlu1 %v623_v25, %s1277_s18 }
 0x205   : > { %v629_v26 = vpop.permute.xlu1 %628 }
 0x206   : > { %v642_v31 = vsel %vm640_vm2, %v989_v20, %v629_v26 }
 0x207   : > { %v627_v27 = vpop.permute.xlu0 %626 }
 0x208   : > { %v641_v28 = vsel %vm640_vm2, %v497_v21, %v627_v27 }
 0x209   : > { %v635_v29 = vpop.permute.xlu1 %634 }
 0x20a   : > { %v644_v30 = vsel %vm643_vm3, %v641_v28, %v635_v29 }
 0x20b   : > { %1019 = vmatprep.mubr.msk.f32.mxu1 %vm663_vm4, %v644_v30 }
 0x20d   : > { %v637_v32 = vpop.permute.xlu1 %636 }
 0x20e   : > { %v645_v33 = vsel %vm643_vm3, %v642_v31, %v637_v32 }
 0x20f   : > { %1020 = vmatmul.mubr.msk.f32.vlgmr.msra.gmra.mxu1 %vm663_vm4, %v645_v33 }
 0x2cf   : > { %v1021_v35 = vpop.f32.mrf.mxu1 }
 0x2d0   : > { %v742_v36 = vadd.f32 %v1021_v35, %v950_v34 }
 0x2d1   : > { %v736_v37 = vpop.f32.mrf.mxu1 }
 0x2d2   : > { %v746_v38 = vmax.f32 %v742_v36, 0.0  ;;  %v737_v39 = vadd.f32 %v950_v34, %v736_v37 }
 0x2d4   : > { %748 = vst.msk [vmem:[%s402_s16 + $0x8] sm:$0xff] %vm640_vm2, %v746_v38  ;;  %v745_v40 = vmax.f32 %v737_v39, 0.0 }
 0x2d6   : > { %747 = vst.msk [vmem:[%s402_s16] sm:$0xff] %vm640_vm2, %v745_v40 }
 0x2d7   : > { %1198 = shalt.err (!%p1195_p3)
}
 0x2d8   : > { %s1199_s9 = scalar_lea.hbm %s1523_s17, 256  ;;  %s1203_s21 = scalar_lea.hbm %s1578_s6, 1024 }
 0x2d9   : > { %p1200_p5 = scmp.ne.s32.totalorder %s1523_s17, %s1199_s9  ;;  %p1204_p7 = scmp.lt.s32.totalorder %s1523_s17, %s1578_s6 }
 0x2da   : > { %p1205_p13 = scmp.lt.s32.totalorder %s1203_s21, %s1199_s9 }
 0x2db   : > { %p1201_p4 = pnand %p1200_p5, %p1371_p9 }
 0x2dc   : > { %p1206_p8 = por %p1205_p13, %p1204_p7 }
 0x2dd   : > { %p1202_p6 = pneg %p1201_p4 }
 0x2df   : > { %p1207_p0 = pnand %p1206_p8, %p1202_p6 }
 0x2e1   : > { %1210 = shalt.err (!%p1207_p0)
}
 0x2e2   : > { %s1279_s7 = smov 128   ;;  %s1280_s18 = smov 8  }
 0x2e3   : > { %1028 = dma.vmem_to_hbm [thread:$0]  (%p1371_p9), %s1518_s11, 256, %s1523_s17, %s750_s19, %s1279_s7, %s1279_s7, %s1280_s18  }
 0x2e4 PF: > { %s1599_s20 = sld [smem:[#allocation14_spill]] }
 0x2e5   : > { %s1600_s29 = sld [smem:[#allocation12_spill]] }
 0x2ea   : > { %p1045_p1 = scmp.ge.s32.totalorder %s1599_s20, 2 }
 0x2eb   : > { %s780_s23 = sand.u32 1, %s1600_s29  }
 0x2ec   : > { %p1041_p10 = pnand %p1045_p1, %p1378_p11  ;;  %s781_s30 = scalar_lea.sflag [#allocation4], %s780_s23 }
 0x2ee   : > { %p1042_p12 = pneg %p1041_p10 }
 0x2f0   : > { %1244 = dma.done.wait (%p1042_p12), %s781_s30, 256  }
 0x2f1   : > { %1246 = vsyncadd (%p1042_p12), %s781_s30, 4294967040  ;;  %s25_s26 = sadd.s32 1, %s1599_s20   ;;  %s1602_s8 = sld [smem:[#allocation13_spill]] }
 0x2f2   : > { %p22_p2 = scmp.ge.s32.totalorder %s25_s26, 6   ;;  %s1603_s23 = sld [smem:[#allocation16_spill]] }
 0x2f3   : > { %s1604_s10 = sld [smem:[#allocation15_spill]]  ;;  %s1605_s21 = smov %s1253_s22 }
 0x2f4   : > { %s1607_s24 = smov %s1265_s25 }
 0x2f5   :  { %24 = sbr.rel (!%p22_p2) target bundleno = 10 (0xa), region = 119 }
 0x2f7   : > { %s1606_s22 = smov %s1602_s8 }
 0x2f9   : > { %s1608_s25 = smov %s1604_s10 }
 0x2fa   :  { %786 = vsyncpa [#allocation3], 1 }
 0x2fb   :  { %788 = vsyncpa [#allocation3 + $0x1], 1 }
 0x2fc   :  { %789 = vsyncpa [#allocation6], 1 }
 0x2fd   :  { %791 = vsyncpa [#allocation6 + $0x1], 1 }
 0x2fe   :  { %792 = vsyncpa [#allocation4], 1 }
 0x2ff   :  { %794 = vsyncpa [#allocation4 + $0x1], 1 }

</bundles_post_ra>
